<compile_context>
chip_gen: v7x
topology: tpu7x:2x2x1
jax: 0.10.0
libtpu: 0.0.40
codegen_flags: <defaults>
</compile_context>

<pallas_src>
import jax
import jax.numpy as jnp
from jax.experimental import pallas as pl
from jax.experimental.pallas import tpu as pltpu

_LANE_CHOICES = (1024, 512, 256, 128)   # widest lane-dense width dividing n
_BLOCK_BYTES = 4 * 1024 * 1024          # per-buffer byte budget (per slot)
_MIN_GRID_BLOCKS = 4                    # >= 2 blocks per TC on v7x (2 TCs)
_MIN_BLOCK_ROWS = 64                    # keep blocks big enough to stay near roofline
_MIN_KERNEL_ELEMS = 64 * 1024           # below this, XLA fused exp wins
_VMEM_LIMIT_BYTES = 32 * 1024 * 1024    # explicit: v5e default scoped VMEM is 16 MiB


def _round_down8(v: int) -> int:
    return max(8, (v // 8) * 8)


def _round_up8(v: int) -> int:
    return max(8, ((v + 7) // 8) * 8)


def _choose_block_rows(rows: int, lanes: int, itemsize: int) -> int:
    """Largest block under the byte budget, while keeping >= ~4 grid blocks."""
    budget_rows = _round_down8(_BLOCK_BYTES // (lanes * itemsize))
    target_rows = max(_MIN_BLOCK_ROWS, _round_up8(pl.cdiv(rows, _MIN_GRID_BLOCKS)))
    block_rows = min(budget_rows, target_rows, rows)
    if block_rows < rows:
        # (8, 128) rule: second-to-last block dim must be a multiple of 8
        # unless it equals the full array extent.
        block_rows = _round_down8(block_rows)
    return block_rows


def _scale_exp_kernel(scale_ref, x_ref, o_ref):
    # scale_ref: SMEM (1, 1) f32; x_ref / o_ref: (block_rows, lanes) VMEM tiles.
    s = scale_ref[0, 0]
    x = x_ref[...].astype(jnp.float32)            # compute in f32 (torch param is f32)
    o_ref[...] = jnp.exp(x * s).astype(o_ref.dtype)


def _scale_exp_xla(x: jax.Array, s: jax.Array) -> jax.Array:
    # Fused single-pass fallback (1 read + 1 write): used for tiny and
    # irregularly-sized tensors where a pallas_call adds only overhead/copies.
    return jnp.exp(x.astype(jnp.float32) * s).astype(x.dtype)


def scale_exp(x: jax.Array, scale: jax.Array, *,
              min_kernel_elems: int = _MIN_KERNEL_ELEMS) -> jax.Array:
    """exp(x * scale); `scale` is a scalar (shape (1,), like the torch Parameter)."""
    orig_shape = x.shape
    orig_dtype = x.dtype
    n = x.size
    s = jnp.asarray(scale, dtype=jnp.float32).reshape(())

    # Small-input fast path: no pipelining to exploit, fixed call overhead wins.
    if n == 0 or n < min_kernel_elems:
        return _scale_exp_xla(x, s)

    # Lane-dense width taken from the tensor's own factorization: no padding,
    # no extra HBM copies (contiguous reshape is a free metadata change).
    lanes = None
    for cand in _LANE_CHOICES:
        if n % cand == 0:
            lanes = cand
            break
    if lanes is None:
        # Irregular size: a pad+slice path would add ~2 extra full-array HBM
        # copies to a bandwidth-bound op; XLA's fused pass is strictly faster.
        return _scale_exp_xla(x, s)

    rows = n // lanes
    itemsize = jnp.dtype(orig_dtype).itemsize
    block_rows = _choose_block_rows(rows, lanes, itemsize)
    grid = (pl.cdiv(rows, block_rows),)

    x2d = x.reshape(rows, lanes)          # free reshape of contiguous data
    scale_smem = s.reshape(1, 1)

    out2d = pl.pallas_call(
        _scale_exp_kernel,
        out_shape=jax.ShapeDtypeStruct((rows, lanes), orig_dtype),
        grid=grid,
        in_specs=[
            pl.BlockSpec(memory_space=pltpu.MemorySpace.SMEM),      # scale scalar
            pl.BlockSpec((block_rows, lanes), lambda i: (i, 0)),    # x tile
        ],
        out_specs=pl.BlockSpec((block_rows, lanes), lambda i: (i, 0)),
        compiler_params=pltpu.CompilerParams(
            dimension_semantics=("parallel",),
            vmem_limit_bytes=_VMEM_LIMIT_BYTES,
        ),
    )(scale_smem, x2d)

    return out2d.reshape(orig_shape)


if __name__ == "__main__":
    key = jax.random.PRNGKey(0)
    k1, k2, k3 = jax.random.split(key, 3)

    # Deterministic parameter, matching nn.Parameter([init_value=1.0]).
    scale = jnp.array([1.0], dtype=jnp.float32)

    # 1) Module-sized NCHW input: exercises the small-tensor fast path.
    x = jax.random.normal(k1, (2, 4, 16, 16), dtype=jnp.float32)
    ref = jnp.exp(x * scale[0])
    out = jax.block_until_ready(scale_exp(x, scale))
    assert out.shape == x.shape and out.dtype == x.dtype
    assert jnp.allclose(out, ref, rtol=1e-6, atol=1e-6)

    # 2) Same input forced through the Pallas kernel (single full-extent block).
    out_k = jax.block_until_ready(scale_exp(x, scale, min_kernel_elems=0))
    assert out_k.shape == x.shape and out_k.dtype == x.dtype
    assert jnp.allclose(out_k, ref, rtol=1e-6, atol=1e-6)

    # 3) Medium input: multi-block pipelined kernel path (grid of ~4 blocks).
    x_med = jax.random.normal(k2, (8, 16, 64, 64), dtype=jnp.float32)
    ref_med = jnp.exp(x_med * scale[0])
    out_med = jax.block_until_ready(scale_exp(x_med, scale))
    assert out_med.shape == x_med.shape and out_med.dtype == x_med.dtype
    assert jnp.allclose(out_med, ref_med, rtol=1e-6, atol=1e-6)

    # 4) Irregular size (not a multiple of 128): fused XLA fallback path.
    x_irr = jax.random.normal(k3, (3, 5, 7, 11), dtype=jnp.float32)
    ref_irr = jnp.exp(x_irr * scale[0])
    out_irr = jax.block_until_ready(scale_exp(x_irr, scale))
    assert out_irr.shape == x_irr.shape and out_irr.dtype == x_irr.dtype
    assert jnp.allclose(out_irr, ref_irr, rtol=1e-6, atol=1e-6)

    print("KERNEL_OK")
</pallas_src>

<mosaic_0001>
module attributes {stable_mosaic.version = 11 : i64} {
  func.func @_scale_exp_kernel(%arg0: i32, %arg1: memref<1x1xf32, #tpu.memory_space<smem>>, %arg2: memref<2x1024xf32, #tpu.memory_space<vmem>>, %arg3: memref<2x1024xf32, #tpu.memory_space<vmem>>) attributes {dimension_semantics = [#tpu.dimension_semantics<parallel>], iteration_bounds = array<i64: 1>, scalar_prefetch = 0 : i64, scratch_operands = 0 : i64, tpu.core_type = #tpu.core_type<tc>, window_params = [{transform_indices = @transform_0, window_bounds = array<i64: 1, 1>}, {transform_indices = @transform_1, window_bounds = array<i64: 2, 1024>}, {transform_indices = @transform_2, window_bounds = array<i64: 2, 1024>}]} {
    %c0 = arith.constant 0 : index
    %c0_0 = arith.constant 0 : index
    %0 = memref.load %arg1[%c0, %c0_0] : memref<1x1xf32, #tpu.memory_space<smem>>
    %c0_1 = arith.constant 0 : index
    %c0_2 = arith.constant 0 : index
    %1 = vector.load %arg2[%c0_1, %c0_2] : memref<2x1024xf32, #tpu.memory_space<vmem>>, vector<2x1024xf32>
    %2 = vector.broadcast %0 : f32 to vector<2x1024xf32>
    %3 = arith.mulf %1, %2 : vector<2x1024xf32>
    %4 = math.exp %3 : vector<2x1024xf32>
    %c0_3 = arith.constant 0 : index
    %c0_4 = arith.constant 0 : index
    %5 = vector.load %arg3[%c0_3, %c0_4] : memref<2x1024xf32, #tpu.memory_space<vmem>>, vector<2x1024xf32>
    tpu.vector_store %arg3[%c0_3, %c0_4], %4 {strides = array<i32>} : memref<2x1024xf32, #tpu.memory_space<vmem>>, vector<2x1024xf32>,
    return
  }
  func.func @transform_0(%arg0: i32) -> (i32, i32) {
    %c0_i32 = arith.constant 0 : i32
    %c0_i32_0 = arith.constant 0 : i32
    %c0_i32_1 = arith.constant 0 : i32
    return %c0_i32, %c0_i32_0 : i32, i32
  }
  func.func @transform_1(%arg0: i32) -> (i32, i32) {
    %c0_i32 = arith.constant 0 : i32
    %c0_i32_0 = arith.constant 0 : i32
    return %arg0, %c0_i32 : i32, i32
  }
  func.func @transform_2(%arg0: i32) -> (i32, i32) {
    %c0_i32 = arith.constant 0 : i32
    %c0_i32_0 = arith.constant 0 : i32
    return %arg0, %c0_i32 : i32, i32
  }
}

</mosaic_0001>

<bundles_post_ra>
// kernel: tpu_custom_call.1
= control target key start
LH: loop header
LB: loop body
LE: loop exit
PB: predicated region body
PF: predicated region fallthrough
CT: control target
= control target key end

     0   :  { %8 = vsyncpa [#allocation4], 0  ;;  %s150_s0 = inlined_call_operand.<no memory space> [shape: f32[1,1], index: 0, kind: input, shape index: {}]   ;;  %s151_s1 = inlined_call_operand.hbm [shape: f32[2,1024], index: 1, kind: input, shape index: {}]   ;;  %s152_s2 = inlined_call_operand.hbm [shape: f32[2,1024], index: 2, kind: output, shape index: {}]  }
   0x1   :  { %9 = vsyncpa [#allocation5], 0  ;;  %s106_s9 = smov [#allocation3]   ;;  %s58_s13 = scalar_lea.hbm %s151_s1, 256 }
   0x2   :  { %s18_s10 = sshll.u32 %s106_s9, 4  ;;  %p59_p0 = scmp.ne.s32.totalorder %s151_s1, %s58_s13  ;;  %s19_s10 = int_to_ptr.vmem [resolvable:$true] %s18_s10 }
   0x3   :  { %p62_p1 = scmp.lt.u32.totalorder %s58_s13, %s151_s1 }
   0x5   :  { %p64_p2 = pnand %p62_p1, %p59_p0 }
   0x7   :  { %67 = shalt.err (!%p64_p2)
}
   0x8   :  { %s68_s18 = scalar_lea.vmem %s19_s10, 256  ;;  %p73_p4 = scmp.lt.s32.totalorder %s19_s10, %s19_s10 }
   0x9   :  { %p69_p3 = scmp.ne.s32.totalorder %s19_s10, %s68_s18  ;;  %p74_p5 = scmp.lt.s32.totalorder %s68_s18, %s68_s18 }
   0xb   :  { %p75_p6 = por %p74_p5, %p73_p4 }
   0xd   :  { %p76_p7 = pnand %p75_p6, %p69_p3 }
   0xf   :  { %79 = shalt.err (!%p76_p7)
}
  0x10   :  { %21 = dma.hbm_to_vmem [thread:$0]  %s151_s1, 256, %s19_s10, [#allocation4]  }
  0x11   :  { %102 = dma.done.wait [#allocation4], 256  }
  0x12   :  { %103 = vsyncadd [#allocation4], 4294967040  ;;  %v28_v0 = vstv %s150_s0  ;;  %v26_v1 = vld [vmem:[#allocation3] sm:$0xff]  ;;  %v27_v2 = vld [vmem:[#allocation3 + $0x8] sm:$0xff]  ;;  %s107_s23 = smov [#allocation6]  }
  0x13   :  { %v29_v3 = vmul.f32 %v28_v0, %v26_v1  ;;  %v30_v4 = vmul.f32 %v28_v0, %v27_v2  ;;  %s43_s24 = sshll.u32 %s107_s23, 4  ;;  %s44_s24 = int_to_ptr.vmem [resolvable:$true] %s43_s24 }
  0x14   :  { %s80_s1 = scalar_lea.vmem %s44_s24, 256  ;;  %p85_p9 = scmp.lt.s32.totalorder %s44_s24, %s44_s24 }
  0x15   :  { %v31_v5 = vmul.f32 1.442695, %v29_v3  ;;  %v33_v6 = vmul.f32 1.442695, %v30_v4  ;;  %p81_p8 = scmp.ne.s32.totalorder %s44_s24, %s80_s1  ;;  %p86_p10 = scmp.lt.s32.totalorder %s80_s1, %s80_s1 }
  0x17   :  { %54 = vpow2.f32 %v31_v5  ;;  %p87_p11 = por %p86_p10, %p85_p9 }
  0x18   :  { %56 = vpow2.f32 %v33_v6 }
  0x19   :  { %p88_p12 = pnand %p87_p11, %p81_p8 }
  0x21   :  { %v55_v7 = vpop.eup %54 }
  0x22   :  { %v57_v8 = vpop.eup %56  ;;  %35 = vst [vmem:[#allocation6] sm:$0xff] %v55_v7 }
  0x23   :  { %36 = vst [vmem:[#allocation6 + $0x8] sm:$0xff] %v57_v8 }
  0x24   :  { %91 = shalt.err (!%p88_p12)
}
  0x25   :  { %s92_s26 = scalar_lea.hbm %s152_s2, 256 }
  0x26   :  { %p93_p13 = scmp.ne.s32.totalorder %s152_s2, %s92_s26  ;;  %p96_p0 = scmp.lt.u32.totalorder %s92_s26, %s152_s2 }
  0x28   :  { %p98_p1 = pnand %p96_p0, %p93_p13 }
  0x2a   :  { %101 = shalt.err (!%p98_p1)
}
  0x2b   :  { %46 = dma.vmem_to_hbm [thread:$0]  %s44_s24, 256, %s152_s2, [#allocation5]  }
  0x2c   :  { %104 = dma.done.wait [#allocation5], 256  }
  0x2d   :  { %105 = vsyncadd [#allocation5], 4294967040 }
  0x2e   :  { %50 = vsyncpa [#allocation4], 1 }
  0x2f   :  { %51 = vsyncpa [#allocation5], 1 }

</bundles_post_ra>
